<compile_context>
chip_gen: v7x
topology: tpu7x:2x2x1
jax: 0.10.0
libtpu: 0.0.40
codegen_flags: <defaults>
</compile_context>

<pallas_src>
import functools

import jax
import jax.numpy as jnp
from jax.experimental import pallas as pl
from jax.experimental.pallas import tpu as pltpu


# Scoped-VMEM request that fits every generation (v7x has only 64 MiB per TensorCore).
_VMEM_LIMIT = 48 * 1024 * 1024


def _round_up(n, m):
    return ((n + m - 1) // m) * m


def _node_tiling(n):
    """(n_pad, tm, tk) over the node dimension.

    Small/medium graphs: full-dim blocks, padded only to the int8 sublane tile (32),
    so a 16-node toy graph is NOT inflated 8x to 128 rows. Large graphs: 512-row /
    512-1024-col tiles (fewer grid steps, >=512 needed to approach HBM roofline).
    """
    n_small = _round_up(n, 32)
    if n_small <= 1024:
        return n_small, n_small, n_small
    n_pad = _round_up(n, 512)
    tk = 1024 if n_pad % 1024 == 0 else 512
    return n_pad, 512, tk


def _graph_tiling(g):
    """(g_pad, tg): pad G to the bf16 sublane tile (16); tile at 128 when large."""
    g_small = _round_up(g, 16)
    if g_small <= 512:
        return g_small, g_small
    g_pad = _round_up(g, 128)
    return g_pad, 128


def _pad2(x, shape):
    return jnp.pad(x, [(0, s - d) for d, s in zip(x.shape, shape)])


# --------------------- fused GCN layer kernel (agg + W + bias + relu) ---------------------

def _gcn_layer_kernel(a_ref, h_ref, dinv_ref, w_ref, b_ref, o_ref, acc_ref, *, scale_output):
    k = pl.program_id(1)

    @pl.when(k == 0)
    def _init():
        acc_ref[...] = jnp.zeros_like(acc_ref)

    # Aggregation: acc += (A+I)[i-tile, k-tile] @ S[k-tile, :], S = D^-1/2 H (bf16).
    # A streams from HBM as int8 (half the bytes of bf16) and is widened on the VPU
    # just before the MXU; accumulation is f32.
    a_bf16 = a_ref[...].astype(jnp.bfloat16)
    acc_ref[...] += jnp.dot(a_bf16, h_ref[...], preferred_element_type=jnp.float32)

    @pl.when(k == pl.num_programs(1) - 1)
    def _finalize():
        # Row scaling by D^-1/2 completes A_hat @ H; then the resident 128-wide W,
        # bias and relu are fused here (no HBM round-trip of the aggregated features).
        agg = acc_ref[...] * dinv_ref[...]
        z = jnp.dot(agg.astype(jnp.bfloat16), w_ref[...],
                    preferred_element_type=jnp.float32) + b_ref[...]
        z = jnp.maximum(z, 0.0)
        if scale_output:
            z = z * dinv_ref[...]          # pre-scale output for the next GCN layer
        o_ref[...] = z.astype(o_ref.dtype)


def gcn_layer(a_int8, h_scaled, dinv, w, b, *, scale_output, tm, tk):
    """relu(D^-1/2 (A+I) D^-1/2 H W + b), with H passed pre-scaled (h_scaled = D^-1/2 H).

    If scale_output, the stored result is additionally scaled by D^-1/2 so it can feed
    the next GCN layer directly.
    """
    n_pad = a_int8.shape[0]
    c_in = h_scaled.shape[1]
    c_out = w.shape[1]
    kernel = functools.partial(_gcn_layer_kernel, scale_output=scale_output)
    return pl.pallas_call(
        kernel,
        out_shape=jax.ShapeDtypeStruct((n_pad, c_out), jnp.bfloat16),
        grid_spec=pltpu.PrefetchScalarGridSpec(
            num_scalar_prefetch=0,
            grid=(n_pad // tm, n_pad // tk),
            in_specs=[
                pl.BlockSpec((tm, tk), lambda i, k: (i, k)),       # (A+I) int8 stream
                pl.BlockSpec((tk, c_in), lambda i, k: (k, 0)),     # S = D^-1/2 H (bf16)
                pl.BlockSpec((tm, 1), lambda i, k: (i, 0)),        # D^-1/2 of output rows
                pl.BlockSpec((c_in, c_out), lambda i, k: (0, 0)),  # W resident (bf16)
                pl.BlockSpec((1, c_out), lambda i, k: (0, 0)),     # bias (f32)
            ],
            out_specs=pl.BlockSpec((tm, c_out), lambda i, k: (i, 0)),
            scratch_shapes=[pltpu.VMEM((tm, c_in), jnp.float32)],
        ),
        compiler_params=pltpu.CompilerParams(
            dimension_semantics=("parallel", "arbitrary"),
            vmem_limit_bytes=_VMEM_LIMIT),
    )(a_int8, h_scaled, dinv, w, b)


# ------------------ fused mean-pool readout + 3-layer MLP head kernel --------------------

def _pool_head_kernel(p_ref, h_ref, cnt_ref, wc1_ref, bc1_ref, wc2_ref, bc2_ref,
                      wc3_ref, bc3_ref, o_ref, acc_ref):
    k = pl.program_id(1)

    @pl.when(k == 0)
    def _init():
        acc_ref[...] = jnp.zeros_like(acc_ref)

    # Sum-pool as a matmul with an exact 0/1 bf16 pooling matrix.
    acc_ref[...] += jnp.dot(p_ref[...], h_ref[...], preferred_element_type=jnp.float32)

    @pl.when(k == pl.num_programs(1) - 1)
    def _finalize():
        r = acc_ref[...] / jnp.maximum(cnt_ref[...], 1.0)     # mean pooling, f32 divide
        z = jnp.dot(r.astype(jnp.bfloat16), wc1_ref[...],
                    preferred_element_type=jnp.float32) + bc1_ref[...]
        z = jnp.maximum(z, 0.0)
        z = jnp.dot(z.astype(jnp.bfloat16), wc2_ref[...],
                    preferred_element_type=jnp.float32) + bc2_ref[...]
        z = jnp.maximum(z, 0.0)
        # Linear(hidden, 1): lane reduction instead of a width-1 MXU matmul.
        logits = jnp.sum(z * wc3_ref[...], axis=-1, keepdims=True) + bc3_ref[...]
        # Lane-dense (unmasked) store; wrapper slices column 0.
        o_ref[...] = jnp.broadcast_to(logits, o_ref.shape)


def pool_and_head(p01, h_final, counts, wc1, bc1, wc2, bc2, wc3, bc3, *, tg, tk):
    g_pad, n_pad = p01.shape
    h_pad = h_final.shape[1]
    return pl.pallas_call(
        _pool_head_kernel,
        out_shape=jax.ShapeDtypeStruct((g_pad, 128), jnp.float32),
        grid_spec=pltpu.PrefetchScalarGridSpec(
            num_scalar_prefetch=0,
            grid=(g_pad // tg, n_pad // tk),   # leading parallel axis -> v7x megacore
            in_specs=[
                pl.BlockSpec((tg, tk), lambda g, k: (g, k)),     # P (0/1 bf16)
                pl.BlockSpec((tk, h_pad), lambda g, k: (k, 0)),  # H2 node tiles (bf16)
                pl.BlockSpec((tg, 1), lambda g, k: (g, 0)),      # per-graph node counts
                pl.BlockSpec(wc1.shape, lambda g, k: (0, 0)),
                pl.BlockSpec(bc1.shape, lambda g, k: (0, 0)),
                pl.BlockSpec(wc2.shape, lambda g, k: (0, 0)),
                pl.BlockSpec(bc2.shape, lambda g, k: (0, 0)),
                pl.BlockSpec(wc3.shape, lambda g, k: (0, 0)),
                pl.BlockSpec(bc3.shape, lambda g, k: (0, 0)),
            ],
            out_specs=pl.BlockSpec((tg, 128), lambda g, k: (g, 0)),
            scratch_shapes=[pltpu.VMEM((tg, h_pad), jnp.float32)],
        ),
        compiler_params=pltpu.CompilerParams(
            dimension_semantics=("parallel", "arbitrary"),
            vmem_limit_bytes=_VMEM_LIMIT),
    )(p01, h_final, counts, wc1, bc1, wc2, bc2, wc3, bc3)


# ------------------------------- plain-JAX graph glue -------------------------------------

def build_graph_operands(x, edge_index, batch, num_graphs, n_pad, g_pad, f_pad):
    """Build kernel operands directly at padded shape / final dtype.

    Note: like the previous version (and unlike torch_geometric's gcn_norm), duplicate
    edges / pre-existing self loops are summed rather than deduplicated.
    """
    n, _ = x.shape
    src, dst = edge_index[0], edge_index[1]

    # (A + I) as int8 at padded shape (one int32 scatter temp, then a single cast).
    a = jnp.zeros((n_pad, n_pad), jnp.int32)
    a = a.at[dst, src].add(1)                               # message j -> i lands in A[i, j]
    diag = jnp.arange(n, dtype=jnp.int32)
    a = a.at[diag, diag].add(1)                             # self loops
    a_int8 = a.astype(jnp.int8)

    # Degrees from the edge list (no N^2 reduction); padded rows get deg 0 -> dinv 0.
    deg = jnp.zeros((n_pad,), jnp.float32).at[dst].add(1.0)
    deg = deg + (jnp.arange(n_pad) < n).astype(jnp.float32)
    dinv = jnp.where(deg > 0.0, jax.lax.rsqrt(jnp.maximum(deg, 1.0)), 0.0)
    dinv = dinv.reshape(n_pad, 1)

    # S0 = D^-1/2 X, bf16, at padded shape.
    x_scaled = (dinv * _pad2(x, (n_pad, f_pad))).astype(jnp.bfloat16)

    # Exact 0/1 pooling matrix + per-graph node counts (mean applied in-kernel in f32).
    batch_p = jnp.full((n_pad,), -1, jnp.int32).at[:n].set(batch)
    p01 = (batch_p[None, :] == jnp.arange(g_pad, dtype=jnp.int32)[:, None]
           ).astype(jnp.bfloat16)
    counts = jnp.zeros((g_pad,), jnp.float32).at[batch].add(1.0).reshape(g_pad, 1)
    return a_int8, dinv, x_scaled, p01, counts


# --------------------------------- forward wrapper ----------------------------------------

def barebone_gcn_forward(x, edge_index, batch, num_graphs, params):
    (w0, b0, w1, b1, wc1, bc1, wc2, bc2, wc3, bc3) = params
    n, f_in = x.shape
    hidden = w0.shape[1]

    n_pad, tm, tk = _node_tiling(n)
    g_pad, tg = _graph_tiling(num_graphs)
    f_pad = _round_up(f_in, 128)          # lane (last) dims stay 128-dense
    h_pad = _round_up(hidden, 128)

    a_int8, dinv, x_scaled, p01, counts = build_graph_operands(
        x, edge_index, batch, num_graphs, n_pad, g_pad, f_pad)

    w0_p = _pad2(w0, (f_pad, h_pad)).astype(jnp.bfloat16)
    w1_p = _pad2(w1, (h_pad, h_pad)).astype(jnp.bfloat16)
    wc1_p = _pad2(wc1, (h_pad, h_pad)).astype(jnp.bfloat16)
    wc2_p = _pad2(wc2, (h_pad, h_pad)).astype(jnp.bfloat16)
    wc3_p = _pad2(wc3, (1, h_pad)).astype(jnp.float32)
    b0_p = _pad2(b0, (1, h_pad)).astype(jnp.float32)
    b1_p = _pad2(b1, (1, h_pad)).astype(jnp.float32)
    bc1_p = _pad2(bc1, (1, h_pad)).astype(jnp.float32)
    bc2_p = _pad2(bc2, (1, h_pad)).astype(jnp.float32)
    bc3_p = bc3.astype(jnp.float32)

    # GCN layer 0: fused aggregate + W0 + bias + relu; output pre-scaled by D^-1/2 for
    # direct consumption by layer 1. (Kernel aggregates first; with f_pad == h_pad the
    # operand order is cost-neutral. TODO(synk): transform-first variant if f_pad > h_pad.)
    # F.dropout is the identity at inference time and is omitted.
    s1 = gcn_layer(a_int8, x_scaled, dinv, w0_p, b0_p, scale_output=True, tm=tm, tk=tk)
    # GCN layer 1: unscaled relu output feeds the mean-pool readout.
    h2 = gcn_layer(a_int8, s1, dinv, w1_p, b1_p, scale_output=False, tm=tm, tk=tk)

    # Mean-pool readout + 3-layer MLP head, fused into one streaming kernel.
    logits_full = pool_and_head(p01, h2, counts, wc1_p, bc1_p, wc2_p, bc2_p,
                                wc3_p, bc3_p, tg=tg, tk=tk)
    return logits_full[:num_graphs, :1]


if __name__ == "__main__":
    # Small synthetic problem: 2 graphs of 8 nodes each, 8 input features,
    # hidden_channels=32, num_layers=2 (1 initial GCNConv + 1 stacked GCNConv).
    num_nodes = 16
    in_features = 8
    hidden = 32
    num_graphs = 2

    key = jax.random.PRNGKey(0)
    keys = jax.random.split(key, 12)

    # Node features.
    x = jax.random.normal(keys[0], (num_nodes, in_features), jnp.float32)

    # Edge index: a ring inside each 8-node graph, made symmetric (shape [2, E]).
    nodes = jnp.arange(num_nodes, dtype=jnp.int32)
    ring_dst = (nodes + 1) % 8 + (nodes // 8) * 8
    edge_index = jnp.stack([
        jnp.concatenate([nodes, ring_dst]),
        jnp.concatenate([ring_dst, nodes]),
    ])
    batch = jnp.concatenate([
        jnp.zeros(8, jnp.int32), jnp.ones(8, jnp.int32)
    ])

    # Deterministic parameter init (GCNConv weight [Fin, H] + bias [1, H]; Linear weights).
    def winit(k, shape, scale=0.1):
        return scale * jax.random.normal(k, shape, jnp.float32)

    w0 = winit(keys[1], (in_features, hidden))
    b0 = winit(keys[2], (1, hidden))
    w1 = winit(keys[3], (hidden, hidden))
    b1 = winit(keys[4], (1, hidden))
    wc1 = winit(keys[5], (hidden, hidden))
    bc1 = winit(keys[6], (1, hidden))
    wc2 = winit(keys[7], (hidden, hidden))
    bc2 = winit(keys[8], (1, hidden))
    wc3 = winit(keys[9], (1, hidden))   # Linear(hidden, 1) weight, stored transposed [1, H]
    bc3 = winit(keys[10], (1, 1))
    params = (w0, b0, w1, b1, wc1, bc1, wc2, bc2, wc3, bc3)

    logits = barebone_gcn_forward(x, edge_index, batch, num_graphs, params)
    jax.block_until_ready(logits)

    assert logits.shape == (num_graphs, 1) and logits.dtype == jnp.float32
    print("KERNEL_OK")
</pallas_src>

<mosaic_0001>
module attributes {stable_mosaic.version = 11 : i64} {
  func.func @_gcn_layer_kernel(%arg0: i32, %arg1: i32, %arg2: memref<32x32xi8, #tpu.memory_space<vmem>>, %arg3: memref<32x128xbf16, #tpu.memory_space<vmem>>, %arg4: memref<32x1xf32, #tpu.memory_space<vmem>>, %arg5: memref<128x128xbf16, #tpu.memory_space<vmem>>, %arg6: memref<1x128xf32, #tpu.memory_space<vmem>>, %arg7: memref<32x128xbf16, #tpu.memory_space<vmem>>, %arg8: memref<32x128xf32, #tpu.memory_space<vmem>>) attributes {dimension_semantics = [#tpu.dimension_semantics<parallel>, #tpu.dimension_semantics<arbitrary>], iteration_bounds = array<i64: 1, 1>, scalar_prefetch = 0 : i64, scratch_operands = 1 : i64, tpu.core_type = #tpu.core_type<tc>, window_params = [{transform_indices = @transform_0, window_bounds = array<i64: 32, 32>}, {transform_indices = @transform_1, window_bounds = array<i64: 32, 128>}, {transform_indices = @transform_2, window_bounds = array<i64: 32, 1>}, {pipeline_mode = #tpu.pipeline_mode<synchronous>, transform_indices = @transform_3, window_bounds = array<i64: 128, 128>}, {pipeline_mode = #tpu.pipeline_mode<synchronous>, transform_indices = @transform_4, window_bounds = array<i64: 1, 128>}, {transform_indices = @transform_5, window_bounds = array<i64: 32, 128>}]} {
    %c0_i32 = arith.constant 0 : i32
    %0 = arith.cmpi eq, %arg1, %c0_i32 : i32
    %1 = arith.extui %0 : i1 to i32
    %c0_i32_0 = arith.constant 0 : i32
    %2 = arith.cmpi ne, %1, %c0_i32_0 : i32
    scf.if %2 {
      %cst_10 = arith.constant 0.000000e+00 : f32
      %13 = vector.broadcast %cst_10 : f32 to vector<32x128xf32>
      %c0_11 = arith.constant 0 : index
      %c0_12 = arith.constant 0 : index
      %14 = vector.load %arg8[%c0_11, %c0_12] : memref<32x128xf32, #tpu.memory_space<vmem>>, vector<32x128xf32>
      tpu.vector_store %arg8[%c0_11, %c0_12], %13 {strides = array<i32>} : memref<32x128xf32, #tpu.memory_space<vmem>>, vector<32x128xf32>,
    } else {
    }
    %c0 = arith.constant 0 : index
    %c0_1 = arith.constant 0 : index
    %3 = vector.load %arg2[%c0, %c0_1] : memref<32x32xi8, #tpu.memory_space<vmem>>, vector<32x32xi8>
    %4 = arith.sitofp %3 : vector<32x32xi8> to vector<32x32xbf16>
    %c0_2 = arith.constant 0 : index
    %c0_3 = arith.constant 0 : index
    %5 = vector.load %arg8[%c0_2, %c0_3] : memref<32x128xf32, #tpu.memory_space<vmem>>, vector<32x128xf32>
    %c0_4 = arith.constant 0 : index
    %c0_5 = arith.constant 0 : index
    %6 = vector.load %arg3[%c0_4, %c0_5] : memref<32x128xbf16, #tpu.memory_space<vmem>>, vector<32x128xbf16>
    %cst = arith.constant dense<0.000000e+00> : vector<32x128xf32>
    %7 = tpu.matmul %4, %6, %cst {dimension_numbers = #tpu.dot_dimension_numbers<[1], [0], [0], [1], [0, 0, 1, 1], [], []>} : vector<32x32xbf16>, vector<32x128xbf16>, vector<32x128xf32> -> vector<32x128xf32>
    %8 = arith.addf %5, %7 : vector<32x128xf32>
    %c0_6 = arith.constant 0 : index
    %c0_7 = arith.constant 0 : index
    %9 = vector.load %arg8[%c0_6, %c0_7] : memref<32x128xf32, #tpu.memory_space<vmem>>, vector<32x128xf32>
    tpu.vector_store %arg8[%c0_6, %c0_7], %8 {strides = array<i32>} : memref<32x128xf32, #tpu.memory_space<vmem>>, vector<32x128xf32>,
    %c0_i32_8 = arith.constant 0 : i32
    %10 = arith.cmpi eq, %arg1, %c0_i32_8 : i32
    %11 = arith.extui %10 : i1 to i32
    %c0_i32_9 = arith.constant 0 : i32
    %12 = arith.cmpi ne, %11, %c0_i32_9 : i32
    scf.if %12 {
      %c0_10 = arith.constant 0 : index
      %c0_11 = arith.constant 0 : index
      %13 = vector.load %arg8[%c0_10, %c0_11] : memref<32x128xf32, #tpu.memory_space<vmem>>, vector<32x128xf32>
      %c0_12 = arith.constant 0 : index
      %c0_13 = arith.constant 0 : index
      %14 = vector.load %arg4[%c0_12, %c0_13] : memref<32x1xf32, #tpu.memory_space<vmem>>, vector<32x1xf32>
      %15 = vector.broadcast %14 : vector<32x1xf32> to vector<32x128xf32>
      %16 = arith.mulf %13, %15 : vector<32x128xf32>
      %17 = arith.truncf %16 : vector<32x128xf32> to vector<32x128xbf16>
      %c0_14 = arith.constant 0 : index
      %c0_15 = arith.constant 0 : index
      %18 = vector.load %arg5[%c0_14, %c0_15] : memref<128x128xbf16, #tpu.memory_space<vmem>>, vector<128x128xbf16>
      %cst_16 = arith.constant dense<0.000000e+00> : vector<32x128xf32>
      %19 = tpu.matmul %17, %18, %cst_16 {dimension_numbers = #tpu.dot_dimension_numbers<[1], [0], [0], [1], [0, 0, 1, 1], [], []>} : vector<32x128xbf16>, vector<128x128xbf16>, vector<32x128xf32> -> vector<32x128xf32>
      %c0_17 = arith.constant 0 : index
      %c0_18 = arith.constant 0 : index
      %20 = vector.load %arg6[%c0_17, %c0_18] : memref<1x128xf32, #tpu.memory_space<vmem>>, vector<1x128xf32>
      %21 = vector.broadcast %20 : vector<1x128xf32> to vector<32x128xf32>
      %22 = arith.addf %19, %21 : vector<32x128xf32>
      %cst_19 = arith.constant 0.000000e+00 : f32
      %23 = vector.broadcast %cst_19 : f32 to vector<32x128xf32>
      %24 = arith.maximumf %22, %23 : vector<32x128xf32>
      %c0_20 = arith.constant 0 : index
      %c0_21 = arith.constant 0 : index
      %25 = vector.load %arg4[%c0_20, %c0_21] : memref<32x1xf32, #tpu.memory_space<vmem>>, vector<32x1xf32>
      %26 = vector.broadcast %25 : vector<32x1xf32> to vector<32x128xf32>
      %27 = arith.mulf %24, %26 : vector<32x128xf32>
      %28 = arith.truncf %27 : vector<32x128xf32> to vector<32x128xbf16>
      %c0_22 = arith.constant 0 : index
      %c0_23 = arith.constant 0 : index
      %29 = vector.load %arg7[%c0_22, %c0_23] : memref<32x128xbf16, #tpu.memory_space<vmem>>, vector<32x128xbf16>
      tpu.vector_store %arg7[%c0_22, %c0_23], %28 {strides = array<i32>} : memref<32x128xbf16, #tpu.memory_space<vmem>>, vector<32x128xbf16>,
    } else {
    }
    return
  }
  func.func @transform_0(%arg0: i32, %arg1: i32) -> (i32, i32) {
    %c0_i32 = arith.constant 0 : i32
    return %arg0, %arg1 : i32, i32
  }
  func.func @transform_1(%arg0: i32, %arg1: i32) -> (i32, i32) {
    %c0_i32 = arith.constant 0 : i32
    %c0_i32_0 = arith.constant 0 : i32
    return %arg1, %c0_i32 : i32, i32
  }
  func.func @transform_2(%arg0: i32, %arg1: i32) -> (i32, i32) {
    %c0_i32 = arith.constant 0 : i32
    %c0_i32_0 = arith.constant 0 : i32
    return %arg0, %c0_i32 : i32, i32
  }
  func.func @transform_3(%arg0: i32, %arg1: i32) -> (i32, i32) {
    %c0_i32 = arith.constant 0 : i32
    %c0_i32_0 = arith.constant 0 : i32
    %c0_i32_1 = arith.constant 0 : i32
    return %c0_i32, %c0_i32_0 : i32, i32
  }
  func.func @transform_4(%arg0: i32, %arg1: i32) -> (i32, i32) {
    %c0_i32 = arith.constant 0 : i32
    %c0_i32_0 = arith.constant 0 : i32
    %c0_i32_1 = arith.constant 0 : i32
    return %c0_i32, %c0_i32_0 : i32, i32
  }
  func.func @transform_5(%arg0: i32, %arg1: i32) -> (i32, i32) {
    %c0_i32 = arith.constant 0 : i32
    %c0_i32_0 = arith.constant 0 : i32
    return %arg0, %c0_i32 : i32, i32
  }
}

</mosaic_0001>

<bundles_post_ra>
// kernel: tpu_custom_call.1
= control target key start
LH: loop header
LB: loop body
LE: loop exit
PB: predicated region body
PF: predicated region fallthrough
CT: control target
= control target key end

     0   :  { %10 = vsyncpa [#allocation4], 0  ;;  %s563_s0 = inlined_call_operand.vmem [shape: s8[32,32], index: 0, kind: input, shape index: {}]   ;;  %s564_s1 = inlined_call_operand.vmem [shape: bf16[32,128], index: 1, kind: input, shape index: {}]   ;;  %s565_s2 = inlined_call_operand.vmem [shape: f32[32,1], index: 2, kind: input, shape index: {}]   ;;  %s566_s3 = inlined_call_operand.hbm [shape: bf16[128,128], index: 3, kind: input, shape index: {}]   ;;  %s567_s4 = inlined_call_operand.vmem [shape: f32[1,128], index: 4, kind: input, shape index: {}]   ;;  %s568_s5 = inlined_call_operand.hbm [shape: bf16[32,128], index: 5, kind: output, shape index: {}]  }
   0x1   :  { %11 = vsyncpa [#allocation5], 0  ;;  %s472_s18 = smov [#allocation3]   ;;  %s424_s22 = scalar_lea.hbm %s566_s3, 1024 }
   0x2   :  { %s23_s19 = sshll.u32 %s472_s18, 4  ;;  %p425_p0 = scmp.ne.s32.totalorder %s566_s3, %s424_s22  ;;  %s24_s19 = int_to_ptr.vmem [resolvable:$true] %s23_s19 }
   0x3   :  { %p428_p1 = scmp.lt.u32.totalorder %s424_s22, %s566_s3 }
   0x5   :  { %p430_p2 = pnand %p428_p1, %p425_p0 }
   0x7   :  { %433 = shalt.err (!%p430_p2)
}
   0x8   :  { %s434_s27 = scalar_lea.vmem %s24_s19, 1024  ;;  %p439_p4 = scmp.lt.s32.totalorder %s24_s19, %s24_s19 }
   0x9   :  { %p435_p3 = scmp.ne.s32.totalorder %s24_s19, %s434_s27  ;;  %p440_p5 = scmp.lt.s32.totalorder %s434_s27, %s434_s27 }
   0xb   :  { %p441_p6 = por %p440_p5, %p439_p4 }
   0xd   :  { %p442_p7 = pnand %p441_p6, %p435_p3 }
   0xf   :  { %445 = shalt.err (!%p442_p7)
}
  0x10   :  { %s473_s28 = smov 64   ;;  %s474_s29 = smov 4  }
  0x11   :  { %29 = dma.hbm_to_vmem [thread:$0]  %s566_s3, 1024, %s24_s19, [#allocation4], %s473_s28, %s473_s28, %s474_s29  }
  0x12   :  { %468 = dma.done.wait [#allocation4], 1024  }
  0x13   :  { %469 = vsyncadd [#allocation4], 4294966272  ;;  %v475_v0 = vmov 0   ;;  %v414_v1 = vld [vmem:[%s564_s1] sm:$0xff]   ;;  %v415_v2 = vld [vmem:[%s564_s1 + $0x8] sm:$0xff]   ;;  %vm67_vm0 = vcmask 261120  }
  0x14   :  { %412 = vset.pattern.permute.xlu0 %v475_v0  ;;  %413 = vset.pattern.permute.xlu1 %v475_v0  ;;  %v44_v3 = vld [vmem:[%s563_s0] sm:$0xff]  ;;  %v140_v5 = vld [vmem:[%s565_s2 + $0x10] sm:$0xff]  ;;  %v139_v7 = vld [vmem:[%s565_s2 + $0x8] sm:$0xff]  ;;  %s476_s19 = smov [#allocation6]  }
  0x15   :  { %379 = vmatprep.subr.bf16.mxu0 %v414_v1  ;;  %v138_v4 = vld [vmem:[%s565_s2] sm:$0xff]  ;;  %v45_v6 = vunpack.c.l.s8.bf16 %v44_v3  ;;  %v141_v8 = vld [vmem:[%s565_s2 + $0x18] sm:$0xff]  ;;  %154 = vperm.xlu1 %413, %v140_v5   ;;  %v417_v10 = vld [vmem:[#allocation3 + $0x8] sm:$0xff]   ;;  %v46_v11 = vunpack.c.h.s8.bf16 %v44_v3  ;;  %s321_s20 = sshll.u32 %s476_s19, 4  ;;  %s322_s20 = int_to_ptr.vmem [resolvable:$true] %s321_s20 }
  0x16   :  { %380 = vmatpush3.bf16.msra.mxu0 %v414_v1  ;;  %144 = vperm.xlu0 %412, %v138_v4   ;;  %v416_v9 = vld [vmem:[#allocation3] sm:$0xff]   ;;  %v418_v12 = vld [vmem:[#allocation3 + $0x10] sm:$0xff]   ;;  %v419_v13 = vld [vmem:[#allocation3 + $0x18] sm:$0xff]   ;;  %p451_p9 = scmp.lt.s32.totalorder %s322_s20, %s322_s20 }
  0x17   :  { %381 = vmatprep.subr.bf16.mxu0 %v415_v2  ;;  %383 = vmatprep.mubr.msk.bf16.mxu0 %vm67_vm0, %v45_v6  ;;  %v420_v14 = vld [vmem:[#allocation3 + $0x20] sm:$0xff]   ;;  %v421_v15 = vld [vmem:[#allocation3 + $0x28] sm:$0xff]   ;;  %v422_v16 = vld [vmem:[#allocation3 + $0x30] sm:$0xff]  }
  0x18   :  { %387 = vmatprep.subr.bf16.mxu1 %v416_v9  ;;  %v423_v17 = vld [vmem:[#allocation3 + $0x38] sm:$0xff]   ;;  %v337_v32 = vld [vmem:[%s567_s4] ss:$0 sm:$0xff]  ;;  %s446_s4 = scalar_lea.vmem %s322_s20, 256 }
  0x19   :  { %159 = vperm.xlu1 %413, %v141_v8   ;;  %388 = vmatpush3.bf16.msra.mxu1 %v416_v9  ;;  %p447_p8 = scmp.ne.s32.totalorder %s322_s20, %s446_s4  ;;  %p452_p10 = scmp.lt.s32.totalorder %s446_s4, %s446_s4 }
  0x1a   :  { %382 = vmatpush3.bf16.msra.mxu0 %v415_v2  ;;  %149 = vperm.xlu0 %412, %v139_v7  }
  0x1b   :  { %389 = vmatprep.subr.bf16.mxu1 %v417_v10  ;;  %p453_p11 = por %p452_p10, %p451_p9 }
  0x1d   :  { %384 = vmatmul.mubr.msk.bf16.vlgmr.msra.gmra.mrb[0].mxu0 %vm67_vm0, %v46_v11  ;;  %390 = vmatpush3.bf16.msra.mxu1 %v417_v10  ;;  %p454_p12 = pnand %p453_p11, %p447_p8 }
  0x1e   :  { %391 = vmatprep.subr.bf16.mxu1 %v418_v12 }
  0x21   :  { %392 = vmatpush3.bf16.msra.mxu1 %v418_v12 }
  0x22   :  { %393 = vmatprep.subr.bf16.mxu1 %v419_v13 }
  0x25   :  { %394 = vmatpush3.bf16.msra.mxu1 %v419_v13 }
  0x26   :  { %395 = vmatprep.subr.bf16.mxu1 %v420_v14 }
  0x29   :  { %396 = vmatpush3.bf16.msra.mxu1 %v420_v14 }
  0x2a   :  { %397 = vmatprep.subr.bf16.mxu1 %v421_v15 }
  0x2d   :  { %398 = vmatpush3.bf16.msra.mxu1 %v421_v15 }
  0x2e   :  { %399 = vmatprep.subr.bf16.mxu1 %v422_v16 }
  0x31   :  { %400 = vmatpush3.bf16.msra.mxu1 %v422_v16 }
  0x32   :  { %401 = vmatprep.subr.bf16.mxu1 %v423_v17 }
  0x35   :  { %402 = vmatpush3.bf16.msra.mxu1 %v423_v17 }
  0x94   :  { %v155_v18 = vpop.permute.xlu1 %154 }
  0x95   :  { %v145_v19 = vpop.permute.xlu0 %144 }
  0x98   :  { %v160_v22 = vpop.permute.xlu1 %159 }
  0x99   :  { %v150_v24 = vpop.permute.xlu0 %149 }
  0xf0   :  { %v385_v20 = vpop.f32.mrb[0].mxu0 }
  0xf1   :  { %v108_v21 = vpop.f32.mrb[1].mxu0  ;;  %v164_v25 = vmul.f32 %v385_v20, %v155_v18 }
  0xf2   :  { %v386_v23 = vpop.f32.mrb[2].mxu0  ;;  %v162_v28 = vmul.f32 %v145_v19, %v108_v21 }
  0xf3   :  { %v165_v26 = vmul.f32 %v386_v23, %v160_v22  ;;  %v111_v27 = vpop.f32.mrb[3].mxu0 }
  0xf4   :  { %v163_v29 = vmul.f32 %v150_v24, %v111_v27 }
  0xf5   :  { %v167_v30 = vpack.c.bf16 %v165_v26, %v164_v25 }
  0xf6   :  { %v166_v31 = vpack.c.bf16 %v163_v29, %v162_v28 }
  0xf8   :  { %403 = vmatprep.mubr.bf16.mxu1 %v166_v31 }
  0xf9   :  { %404 = vmatmul.mubr.bf16.vlgmr.msra.gmra.mrb[0].mxu1 %v167_v30 }
 0x1cc   :  { %v405_v33 = vpop.f32.mrb[0].mxu1 }
 0x1cd   :  { %v282_v34 = vadd.f32 %v405_v33, %v337_v32  ;;  %v273_v35 = vpop.f32.mrb[1].mxu1 }
 0x1ce   :  { %v274_v36 = vadd.f32 %v337_v32, %v273_v35  ;;  %v406_v37 = vpop.f32.mrb[2].mxu1 }
 0x1cf   :  { %v290_v38 = vmax.f32 %v282_v34, 0.0  ;;  %v285_v39 = vadd.f32 %v406_v37, %v337_v32  ;;  %v276_v40 = vpop.f32.mrb[3].mxu1 }
 0x1d0   :  { %v288_v41 = vmax.f32 %v274_v36, 0.0  ;;  %v277_v42 = vadd.f32 %v337_v32, %v276_v40 }
 0x1d1   :  { %v291_v43 = vmax.f32 %v285_v39, 0.0  ;;  %v294_v45 = vmul.f32 %v290_v38, %v155_v18 }
 0x1d2   :  { %v289_v44 = vmax.f32 %v277_v42, 0.0  ;;  %v292_v47 = vmul.f32 %v288_v41, %v145_v19 }
 0x1d3   :  { %v295_v46 = vmul.f32 %v291_v43, %v160_v22 }
 0x1d4   :  { %v293_v48 = vmul.f32 %v289_v44, %v150_v24 }
 0x1d5   :  { %v362_v49 = vpack.c.bf16 %v295_v46, %v294_v45 }
 0x1d6   :  { %v357_v50 = vpack.c.bf16 %v293_v48, %v292_v47 }
 0x1d7   :  { %364 = vst [vmem:[#allocation6 + $0x8] sm:$0xff] %v362_v49  }
 0x1d8   :  { %358 = vst [vmem:[#allocation6] sm:$0xff] %v357_v50  }
 0x1d9   :  { %457 = shalt.err (!%p454_p12)
}
 0x1da   :  { %s458_s23 = scalar_lea.hbm %s568_s5, 256 }
 0x1db   :  { %p459_p13 = scmp.ne.s32.totalorder %s568_s5, %s458_s23  ;;  %p462_p0 = scmp.lt.u32.totalorder %s458_s23, %s568_s5 }
 0x1dd   :  { %p464_p1 = pnand %p462_p0, %p459_p13 }
 0x1df   :  { %467 = shalt.err (!%p464_p1)
}
 0x1e0   :  { %327 = dma.vmem_to_hbm [thread:$0]  %s322_s20, 256, %s568_s5, [#allocation5], %s473_s28, %s473_s28, %s474_s29  }
 0x1e1   :  { %470 = dma.done.wait [#allocation5], 256  }
 0x1e2   :  { %471 = vsyncadd [#allocation5], 4294967040 }
 0x1e3   :  { %331 = vsyncpa [#allocation4], 1 }
 0x1e4   :  { %332 = vsyncpa [#allocation5], 1 }

</bundles_post_ra>
